<compile_context>
chip_gen: v6e
topology: v6e:2x2x1
jax: 0.10.0
libtpu: 0.0.40
codegen_flags: <defaults>
</compile_context>

<pallas_src>
import functools

import jax
import jax.numpy as jnp
from jax.experimental import pallas as pl
from jax.experimental.pallas import tpu as pltpu


def _round_up(x, m):
    return (x + m - 1) // m * m


def _row_gather_kernel(labels_ref, table_ref, out_ref, sem, *, block_b, num_rows):
    """DMA-gather table rows selected by this block's labels.

    labels_ref: (B_pad,)          int32, SMEM (scalar prefetch)
    table_ref:  (num_rows, H_pad) float, HBM (memory_space=pl.ANY)
    out_ref:    (block_b, H_pad)  float, VMEM output block
    sem:        (block_b,)        DMA semaphores
    """
    base = pl.program_id(0) * block_b

    # Issue one row DMA per label in this block (all in flight concurrently).
    @pl.loop(0, block_b)
    def _(j):
        lbl = jnp.clip(labels_ref[base + j], 0, num_rows - 1)
        pltpu.make_async_copy(table_ref.at[lbl], out_ref.at[j], sem.at[j]).start()

    # Wait for every row before the pipeline writes the output block back.
    @pl.loop(0, block_b)
    def _(j):
        pltpu.make_async_copy(table_ref.at[0], out_ref.at[j], sem.at[j]).wait()


@functools.partial(jax.jit, static_argnames=("out_h",))
def label_embed_pallas(labels, table_padded, out_h):
    """Gather table_padded[labels] with a Pallas TPU kernel.

    labels:       (B,) integer labels
    table_padded: (num_rows, H_pad) float table, H_pad a multiple of 128
    out_h:        true hidden size (output is sliced back to it)
    returns (B, out_h) float
    """
    B = labels.shape[0]
    num_rows, h_pad = table_padded.shape

    block_b = min(128, _round_up(max(B, 1), 8))   # sublane-aligned label block
    b_pad = _round_up(B, block_b)
    nb = b_pad // block_b

    labels = labels.astype(jnp.int32)
    if b_pad != B:
        labels = jnp.zeros((b_pad,), jnp.int32).at[:B].set(labels)

    kernel = functools.partial(
        _row_gather_kernel, block_b=block_b, num_rows=num_rows)

    out = pl.pallas_call(
        kernel,
        out_shape=jax.ShapeDtypeStruct((b_pad, h_pad), table_padded.dtype),
        grid_spec=pltpu.PrefetchScalarGridSpec(
            num_scalar_prefetch=1,
            grid=(nb,),
            in_specs=[pl.BlockSpec(memory_space=pl.ANY)],   # table stays in HBM
            out_specs=pl.BlockSpec((block_b, h_pad), lambda i, labels_ref: (i, 0)),
            scratch_shapes=[pltpu.SemaphoreType.DMA((block_b,))],
        ),
        compiler_params=pltpu.CompilerParams(
            dimension_semantics=("arbitrary",)),
    )(labels, table_padded)

    return out[:B, :out_h]


class LabelEmbedder:
    """JAX/Pallas port of the PyTorch LabelEmbedder (embedding + CFG dropout)."""

    def __init__(self, num_classes, hidden_size, dropout_prob, key):
        use_cfg_embedding = int(dropout_prob > 0)
        num_rows = num_classes + use_cfg_embedding
        # Deterministic synthetic init, same shape as nn.Embedding.
        self.embedding_table = (
            0.02 * jax.random.normal(
                key, (num_rows, hidden_size), dtype=jnp.float32))
        # Pad H to a lane multiple ONCE at init (not per forward call).
        h_pad = _round_up(hidden_size, 128)
        if h_pad != hidden_size:
            self.table_padded = (
                jnp.zeros((num_rows, h_pad), jnp.float32)
                .at[:, :hidden_size].set(self.embedding_table))
        else:
            self.table_padded = self.embedding_table
        self.num_classes = num_classes
        self.hidden_size = hidden_size
        self.dropout_prob = dropout_prob

    def token_drop(self, labels, drop_key=None, force_drop_ids=None):
        if force_drop_ids is None:
            drop_ids = (jax.random.uniform(drop_key, (labels.shape[0],))
                        < self.dropout_prob)
        else:
            drop_ids = force_drop_ids == 1
        return jnp.where(drop_ids, self.num_classes, labels)

    def __call__(self, labels, train, drop_key=None, force_drop_ids=None):
        use_dropout = self.dropout_prob > 0
        if (train and use_dropout) or (force_drop_ids is not None):
            labels = self.token_drop(labels, drop_key, force_drop_ids)
        labels = labels.astype(jnp.int32)
        return label_embed_pallas(labels, self.table_padded,
                                  out_h=self.hidden_size)


if __name__ == "__main__":
    num_classes = 10
    hidden_size = 32
    dropout_prob = 0.1
    batch = 8

    root = jax.random.PRNGKey(0)
    k_table, k_labels, k_drop = jax.random.split(root, 3)

    embedder = LabelEmbedder(num_classes, hidden_size, dropout_prob, k_table)
    labels = jax.random.randint(k_labels, (batch,), 0, num_classes, jnp.int32)

    # Eval path (no dropout): pure embedding lookup.
    emb_eval = embedder(labels, train=False)
    emb_eval = jax.block_until_ready(emb_eval)
    ref_eval = embedder.embedding_table[labels]
    assert emb_eval.shape == (batch, hidden_size)
    assert jnp.allclose(emb_eval, ref_eval, atol=1e-6), "eval-path mismatch"

    # CFG path via force_drop_ids: every other label forced to the null class.
    force_drop_ids = (jnp.arange(batch) % 2).astype(jnp.int32)
    emb_cfg = embedder(labels, train=True, drop_key=k_drop,
                       force_drop_ids=force_drop_ids)
    emb_cfg = jax.block_until_ready(emb_cfg)
    dropped_labels = jnp.where(force_drop_ids == 1, num_classes, labels)
    ref_cfg = embedder.embedding_table[dropped_labels]
    assert jnp.allclose(emb_cfg, ref_cfg, atol=1e-6), "cfg-path mismatch"

    # Train path with random dropout: each row must match either the
    # original-label row or the null-class row.
    emb_train = embedder(labels, train=True, drop_key=k_drop)
    emb_train = jax.block_until_ready(emb_train)
    row_orig = embedder.embedding_table[labels]
    row_null = embedder.embedding_table[jnp.full_like(labels, num_classes)]
    match_orig = jnp.all(jnp.isclose(emb_train, row_orig, atol=1e-6), axis=-1)
    match_null = jnp.all(jnp.isclose(emb_train, row_null, atol=1e-6), axis=-1)
    assert bool(jnp.all(match_orig | match_null)), "train-path mismatch"

    print("KERNEL_OK")
</pallas_src>

<mosaic_0001>
module attributes {stable_mosaic.version = 11 : i64} {
  func.func @_row_gather_kernel(%arg0: i32, %arg1: memref<8xi32, #tpu.memory_space<smem>>, %arg2: memref<11x128xf32, #tpu.memory_space<any>>, %arg3: memref<8x128xf32, #tpu.memory_space<vmem>>, %arg4: memref<8x!tpu.dma_semaphore, #tpu.memory_space<semaphore_mem>>) attributes {dimension_semantics = [#tpu.dimension_semantics<arbitrary>], iteration_bounds = array<i64: 1>, scalar_prefetch = 1 : i64, scratch_operands = 1 : i64, tpu.core_type = #tpu.core_type<tc>, window_params = [{}, {transform_indices = @transform_1, window_bounds = array<i64: 8, 128>}]} {
    %c8_i32 = arith.constant 8 : i32
    %0 = arith.muli %arg0, %c8_i32 : i32
    %c0_i32 = arith.constant 0 : i32
    %c8_i32_0 = arith.constant 8 : i32
    %1 = arith.addi %c0_i32, %c8_i32_0 : i32
    %c1_i32 = arith.constant 1 : i32
    scf.for %arg5 = %c0_i32 to %1 step %c1_i32  : i32 {
      %c1_i32_6 = arith.constant 1 : i32
      %3 = arith.muli %arg5, %c1_i32_6 : i32
      %c0_i32_7 = arith.constant 0 : i32
      %4 = arith.addi %c0_i32_7, %3 : i32
      %5 = arith.addi %0, %4 : i32
      %6 = arith.index_cast %5 : i32 to index
      %7 = memref.load %arg1[%6] : memref<8xi32, #tpu.memory_space<smem>>
      %c0_i32_8 = arith.constant 0 : i32
      %c10_i32 = arith.constant 10 : i32
      %8 = arith.maxsi %c0_i32_8, %7 : i32
      %9 = arith.minsi %c10_i32, %8 : i32
      %c0_i32_9 = arith.constant 0 : i32
      %10 = tpu.memref_slice %arg2[%9, %c0_i32_9] : memref<11x128xf32, #tpu.memory_space<any>> -> memref<1x128xf32, #tpu.memory_space<any>>
      %11 = tpu.memref_squeeze %10 : memref<1x128xf32, #tpu.memory_space<any>> -> memref<128xf32, #tpu.memory_space<any>>
      %c0_i32_10 = arith.constant 0 : i32
      %12 = tpu.memref_slice %arg3[%4, %c0_i32_10] : memref<8x128xf32, #tpu.memory_space<vmem>> -> memref<1x128xf32, #tpu.memory_space<vmem>>
      %13 = tpu.memref_squeeze %12 : memref<1x128xf32, #tpu.memory_space<vmem>> -> memref<128xf32, #tpu.memory_space<vmem>>
      %14 = tpu.memref_slice %arg4[%4] : memref<8x!tpu.dma_semaphore, #tpu.memory_space<semaphore_mem>> -> memref<1x!tpu.dma_semaphore, #tpu.memory_space<semaphore_mem>>
      %15 = tpu.memref_squeeze %14 : memref<1x!tpu.dma_semaphore, #tpu.memory_space<semaphore_mem>> -> memref<!tpu.dma_semaphore, #tpu.memory_space<semaphore_mem>>
      tpu.enqueue_dma source(%11 : memref<128xf32, #tpu.memory_space<any>>) target(%13 : memref<128xf32, #tpu.memory_space<vmem>>) target_semaphore(%15 : memref<!tpu.dma_semaphore, #tpu.memory_space<semaphore_mem>>)
    }
    %c8_i32_1 = arith.constant 8 : i32
    %c0_i32_2 = arith.constant 0 : i32
    %c8_i32_3 = arith.constant 8 : i32
    %2 = arith.addi %c0_i32_2, %c8_i32_3 : i32
    %c1_i32_4 = arith.constant 1 : i32
    scf.for %arg5 = %c0_i32_2 to %2 step %c1_i32_4  : i32 {
      %c1_i32_6 = arith.constant 1 : i32
      %3 = arith.muli %arg5, %c1_i32_6 : i32
      %c0_i32_7 = arith.constant 0 : i32
      %4 = arith.addi %c0_i32_7, %3 : i32
      %c0_i32_8 = arith.constant 0 : i32
      %c0_i32_9 = arith.constant 0 : i32
      %5 = tpu.memref_slice %arg2[%c0_i32_8, %c0_i32_9] : memref<11x128xf32, #tpu.memory_space<any>> -> memref<1x128xf32, #tpu.memory_space<any>>
      %6 = tpu.memref_squeeze %5 : memref<1x128xf32, #tpu.memory_space<any>> -> memref<128xf32, #tpu.memory_space<any>>
      %c0_i32_10 = arith.constant 0 : i32
      %7 = tpu.memref_slice %arg3[%4, %c0_i32_10] : memref<8x128xf32, #tpu.memory_space<vmem>> -> memref<1x128xf32, #tpu.memory_space<vmem>>
      %8 = tpu.memref_squeeze %7 : memref<1x128xf32, #tpu.memory_space<vmem>> -> memref<128xf32, #tpu.memory_space<vmem>>
      %9 = tpu.memref_slice %arg4[%4] : memref<8x!tpu.dma_semaphore, #tpu.memory_space<semaphore_mem>> -> memref<1x!tpu.dma_semaphore, #tpu.memory_space<semaphore_mem>>
      %10 = tpu.memref_squeeze %9 : memref<1x!tpu.dma_semaphore, #tpu.memory_space<semaphore_mem>> -> memref<!tpu.dma_semaphore, #tpu.memory_space<semaphore_mem>>
      tpu.wait_dma2 semaphore(%10 : memref<!tpu.dma_semaphore, #tpu.memory_space<semaphore_mem>>) src(%6 : memref<128xf32, #tpu.memory_space<any>>) dst(%8 : memref<128xf32, #tpu.memory_space<vmem>>)
    }
    %c8_i32_5 = arith.constant 8 : i32
    return
  }
  func.func @transform_1(%arg0: i32, %arg1: memref<8xi32, #tpu.memory_space<smem>>) -> (i32, i32) {
    %c0_i32 = arith.constant 0 : i32
    %c0_i32_0 = arith.constant 0 : i32
    return %arg0, %c0_i32 : i32, i32
  }
}

</mosaic_0001>

<bundles_post_ra>
// kernel: label_embed_pallas.1
= control target key start
LH: loop header
LB: loop body
LE: loop exit
PB: predicated region body
PF: predicated region fallthrough
CT: control target
= control target key end

     0   :  { %s239_s9 = smov [#allocation4]   ;;  %s290_s0 = inlined_call_operand.hbm [shape: s32[8], index: 0, kind: input, shape index: {}]   ;;  %s291_s1 = inlined_call_operand.hbm [shape: f32[11,128], index: 1, kind: input, shape index: {}]   ;;  %s292_s2 = inlined_call_operand.hbm [shape: f32[8,128], index: 2, kind: output, shape index: {}]  }
   0x1   :  { %8 = dma.hbm_to_smem %s290_s0, 16, %s239_s9, [#allocation3] }
   0x2   :  { %225 = dma.done.wait [#allocation3], 16 }
   0x3   :  { %226 = vsyncadd [#allocation3], 4294967280 }
   0x4   :  { %10 = sfence }
   0x5   :  { %11 = vsyncpa [#allocation6], 0  ;;  %s259_s12 = smov 0  }
   0x6 LB: > { %s20_s13 = sld [smem:[#allocation4 + %s233_s12]]  ;;  %s27_s14 = scalar_lea.vmem [#allocation5], %s233_s12  ;;  %s233_s12 = sphi %s259_s12, %s18_s12  }
   0x7   : > { %s36_s15 = sshll.u32 %s27_s14, 4  ;;  %s28_s19 = scalar_lea.sflag [#allocation2], %s233_s12  ;;  %s37_s15 = int_to_ptr.vmem [resolvable:$true] %s36_s15 }
   0x8   : > { %s177_s23 = scalar_lea.hbm %s291_s1, 256 }
   0xc   : > { %p21_p0 = scmp.gt.s32.totalorder %s20_s13, 0  ;;  %p133_p1 = scmp.lt.s32.totalorder %s20_s13, 10 }
   0xe   : > { %s294_s13 = smov (!%p21_p0, %s20_s13), 0 }
   0xf   : > { %s296_s13 = smov (!%p133_p1, %s294_s13), 10 }
  0x10   : > { %s138_s0 = sshll.u32 %s296_s13, 4 }
  0x11   : > { %s26_s18 = scalar_lea.hbm %s291_s1, %s138_s0 }
  0x12   : > { %s175_s20 = scalar_lea.hbm %s26_s18, 16  ;;  %p178_p3 = scmp.lt.s32.totalorder %s26_s18, %s291_s1 }
  0x13   : > { %p176_p2 = scmp.ne.s32.totalorder %s26_s18, %s175_s20  ;;  %p179_p4 = scmp.lt.s32.totalorder %s177_s23, %s175_s20 }
  0x15   : > { %p180_p5 = por %p179_p4, %p178_p3 }
  0x17   : > { %p181_p6 = pnand %p180_p5, %p176_p2 }
  0x19   : > { %184 = shalt.err (!%p181_p6)  }
  0x1a   : > { %s185_s26 = scalar_lea.vmem %s37_s15, 16  ;;  %s240_s27 = smov [#allocation5]  }
  0x1b   : > { %p186_p7 = scmp.ne.s32.totalorder %s37_s15, %s185_s26  ;;  %s187_s28 = sshll.u32 %s240_s27, 4  ;;  %s276_s28 = int_to_ptr.vmem [resolvable:$false] %s187_s28 }
  0x1c   : > { %s189_s29 = scalar_lea.vmem %s276_s28, 128  ;;  %p190_p8 = scmp.lt.s32.totalorder %s37_s15, %s276_s28 }
  0x1d   : > { %p191_p9 = scmp.lt.s32.totalorder %s189_s29, %s185_s26 }
  0x1f   : > { %p192_p10 = por %p191_p9, %p190_p8 }
  0x21   : > { %p193_p11 = pnand %p192_p10, %p186_p7 }
  0x23   : > { %196 = shalt.err (!%p193_p11)  }
  0x24   : > { %39 = dma.hbm_to_vmem [thread:$0]  %s26_s18, 16, %s37_s15, %s28_s19 }
  0x25   : > { %s18_s12 = sadd.s32 1, %s233_s12  }
  0x26   : > { %p15_p12 = scmp.ge.s32.totalorder %s18_s12, 8  }
  0x27   :  { %s235_s30 = smov (%p15_p12), 0  }
  0x28   :  { %17 = sbr.rel (!%p15_p12) target bundleno = 6 (0x6), region = 49 }
  0x2d LB: > { %s46_s3 = scalar_lea.sflag [#allocation2], %s237_s30  ;;  %s237_s30 = sphi %s235_s30, %s45_s30  }
  0x2e   : > { %227 = dma.done.wait %s46_s3, 16 }
  0x2f   : > { %228 = vsyncadd %s46_s3, 4294967280  ;;  %s45_s30 = sadd.s32 1, %s237_s30  }
  0x30   : > { %p42_p13 = scmp.ge.s32.totalorder %s45_s30, 8  }
  0x31   :  { %p198_p0 = scmp.ne.s32.totalorder (%p42_p13), %s276_s28, %s189_s29  ;;  %p202_p1 = scmp.lt.s32.totalorder (%p42_p13), %s276_s28, %s276_s28 }
  0x32   :  { %44 = sbr.rel (!%p42_p13) target bundleno = 45 (0x2d), region = 60  ;;  %p203_p2 = scmp.lt.s32.totalorder (%p42_p13), %s189_s29, %s189_s29 }
  0x34   :  { %p204_p3 = por (%p42_p13), %p203_p2, %p202_p1 }
  0x36   :  { %p205_p4 = pnand (%p42_p13), %p204_p3, %p198_p0 }
  0x38   :  { %208 = shalt.err (!%p205_p4)
}
  0x39   :  { %58 = dma.vmem_to_hbm [thread:$0]  %s276_s28, 128, %s292_s2, [#allocation6]  }
  0x3a   :  { %229 = dma.done.wait [#allocation6], 128  }
  0x3b   :  { %230 = vsyncadd [#allocation6], 4294967168 }
  0x3c   :  { %62 = vsyncpa [#allocation6], 1 }
  0x3d   :  { %63 = vsyncmov [#allocation2] }
  0x40   :  { %s64_s5 = vpop.sfrf %63 }
  0x41   :  { %p139_p5 = scmp.ne.s32.totalorder %s64_s5, 0 }
  0x43   :  { %68 = shalt.err (%p139_p5)  }
  0x44   :  { %70 = vsyncmov [#allocation2 + $0x1] }
  0x47   :  { %s71_s6 = vpop.sfrf %70 }
  0x48   :  { %p140_p6 = scmp.ne.s32.totalorder %s71_s6, 0 }
  0x4a   :  { %75 = shalt.err (%p140_p6)  }
  0x4b   :  { %77 = vsyncmov [#allocation2 + $0x2] }
  0x4e   :  { %s78_s7 = vpop.sfrf %77 }
  0x4f   :  { %p141_p7 = scmp.ne.s32.totalorder %s78_s7, 0 }
  0x51   :  { %82 = shalt.err (%p141_p7)  }
  0x52   :  { %84 = vsyncmov [#allocation2 + $0x3] }
  0x55   :  { %s85_s8 = vpop.sfrf %84 }
  0x56   :  { %p142_p8 = scmp.ne.s32.totalorder %s85_s8, 0 }
  0x58   :  { %89 = shalt.err (%p142_p8)  }
  0x59   :  { %91 = vsyncmov [#allocation2 + $0x4] }
  0x5c   :  { %s92_s2 = vpop.sfrf %91 }
  0x5d   :  { %p143_p9 = scmp.ne.s32.totalorder %s92_s2, 0 }
  0x5f   :  { %96 = shalt.err (%p143_p9)  }
  0x60   :  { %98 = vsyncmov [#allocation2 + $0x5] }
  0x63   :  { %s99_s9 = vpop.sfrf %98 }
  0x64   :  { %p144_p10 = scmp.ne.s32.totalorder %s99_s9, 0 }
  0x66   :  { %103 = shalt.err (%p144_p10)  }
  0x67   :  { %105 = vsyncmov [#allocation2 + $0x6] }
  0x6a   :  { %s106_s10 = vpop.sfrf %105 }
  0x6b   :  { %p145_p11 = scmp.ne.s32.totalorder %s106_s10, 0 }
  0x6d   :  { %110 = shalt.err (%p145_p11)  }
  0x6e   :  { %112 = vsyncmov [#allocation2 + $0x7] }
  0x71   :  { %s113_s11 = vpop.sfrf %112 }
  0x72   :  { %p146_p12 = scmp.ne.s32.totalorder %s113_s11, 0 }
  0x74   :  { %117 = shalt.err (%p146_p12)  }

</bundles_post_ra>
